<compile_context>
chip_gen: v7x
topology: tpu7x:2x2x1
jax: 0.10.0
libtpu: 0.0.40
codegen_flags: <defaults>
</compile_context>

<pallas_src>
import functools
import math

import jax
import jax.numpy as jnp
from jax.experimental import pallas as pl
from jax.experimental.pallas import tpu as pltpu


# ----------------------------- kernel body ----------------------------------


def _sdpa_kernel(*refs, scale, has_mask, write_attn):
    if has_mask:
        q_ref, k_ref, v_ref, m_ref, *out_refs = refs
    else:
        q_ref, k_ref, v_ref, *out_refs = refs
        m_ref = None
    ctx_ref = out_refs[0]
    attn_ref = out_refs[1] if write_attn else None

    # Blocks are (1, Ht, tq|Sk, d); strip the leading size-1 dim.
    q = q_ref[0] * scale            # fold 1/sqrt(d_k) into the small Q tile
    k = k_ref[0]
    v = v_ref[0]

    # Batched QK^T, contracting the last dims (no transposed K tile), f32 acc.
    scores = jnp.einsum("hqd,hkd->hqk", q, k,
                        preferred_element_type=jnp.float32)
    scores = jnp.exp(scores)        # exp-based "softmax", exactly as reference
    if has_mask:
        scores = scores * m_ref[0].astype(jnp.float32)

    denom = jnp.sum(scores, axis=-1, keepdims=True) + 1e-8
    inv = pl.reciprocal(denom, approx=False)   # per-row reciprocal, then VPU mul
    attn = scores * inv

    ctx = jnp.einsum("hqk,hkd->hqd", attn.astype(v.dtype), v,
                     preferred_element_type=jnp.float32)

    ctx_ref[0] = ctx.astype(ctx_ref.dtype)
    if write_attn:
        attn_ref[0] = attn.astype(attn_ref.dtype)


# ----------------------------- tiling helpers --------------------------------


def _pick_seq_tile(sq, cap=256):
    """Largest multiple-of-8 divisor of sq that is <= cap; else whole sq."""
    if sq <= cap:
        return sq
    best = None
    for t in range(8, cap + 1, 8):
        if sq % t == 0:
            best = t
    return best if best is not None else sq


def _pick_head_tile(h, tq, sk, dk, dv, budget_elems=1 << 20):
    """Largest divisor of h whose per-step f32 residency stays ~<= 4 MiB."""
    per_head = tq * dk + sk * (dk + dv) + tq * dv + 2 * tq * sk
    cap = max(1, budget_elems // max(per_head, 1))
    best = 1
    for t in range(1, h + 1):
        if h % t == 0 and t <= cap:
            best = t
    return best


# ----------------------------- public wrapper --------------------------------


def scaled_dot_product_attention(Q, K, V, attn_mask=None, *, d_k=None,
                                 return_attn=True):
    """Pallas implementation of the PyTorch Scaled_Dot_Product_Attention.

    Q, K: (B, H, S_q, d_k) / (B, H, S_k, d_k);  V: (B, H, S_k, d_v).
    attn_mask (optional): broadcastable to (B, H, S_q, S_k) — it is NOT
    materialized at full size; broadcasting happens via index_map / in-kernel.
    Returns (context, attn); attn is None when return_attn=False.
    """
    B, H, Sq, Dk = Q.shape
    Sk = K.shape[-2]
    Dv = V.shape[-1]
    if d_k is None:
        d_k = Dk
    scale = 1.0 / math.sqrt(d_k)

    tq = _pick_seq_tile(Sq)
    Ht = _pick_head_tile(H, tq, Sk, Dk, Dv)
    grid = (B, pl.cdiv(H, Ht), pl.cdiv(Sq, tq))

    q_spec = pl.BlockSpec((1, Ht, tq, Dk), lambda b, h, s: (b, h, s, 0))
    k_spec = pl.BlockSpec((1, Ht, Sk, Dk), lambda b, h, s: (b, h, 0, 0))
    v_spec = pl.BlockSpec((1, Ht, Sk, Dv), lambda b, h, s: (b, h, 0, 0))
    ctx_spec = pl.BlockSpec((1, Ht, tq, Dv), lambda b, h, s: (b, h, s, 0))
    attn_spec = pl.BlockSpec((1, Ht, tq, Sk), lambda b, h, s: (b, h, s, 0))

    in_specs = [q_spec, k_spec, v_spec]
    args = [Q, K, V]
    has_mask = attn_mask is not None

    if has_mask:
        m = jnp.asarray(attn_mask)
        if m.ndim < 4:
            m = m.reshape((1,) * (4 - m.ndim) + m.shape)
        Bm, Hm, Sqm, Skm = m.shape
        if Skm != Sk:                       # key axis must be full in the kernel
            m = jnp.broadcast_to(m, (Bm, Hm, Sqm, Sk))
        if (Bm not in (1, B)) or (Hm not in (1, H)) or (Sqm not in (1, Sq)):
            # Non-trivial broadcast pattern: fall back to a full mask.
            m = jnp.broadcast_to(m, (B, H, Sq, Sk))
            Bm, Hm, Sqm = B, H, Sq
        m_block = (1, Ht if Hm == H else 1, tq if Sqm == Sq else 1, Sk)

        def mask_map(b, h, s, _b=(Bm == B), _h=(Hm == H), _s=(Sqm == Sq)):
            return (b if _b else 0, h if _h else 0, s if _s else 0, 0)

        in_specs.append(pl.BlockSpec(m_block, mask_map))
        args.append(m)

    out_shapes = [jax.ShapeDtypeStruct((B, H, Sq, Dv), Q.dtype)]
    out_specs = [ctx_spec]
    if return_attn:
        # NOTE: attn writeback is O(S^2) HBM store traffic; for Sk < 128 the
        # store is lane-masked (see review) — acceptable at NRMS-scale shapes.
        out_shapes.append(jax.ShapeDtypeStruct((B, H, Sq, Sk), Q.dtype))
        out_specs.append(attn_spec)

    kernel = functools.partial(_sdpa_kernel, scale=scale,
                               has_mask=has_mask, write_attn=return_attn)

    outs = pl.pallas_call(
        kernel,
        out_shape=tuple(out_shapes),
        grid_spec=pltpu.PrefetchScalarGridSpec(
            num_scalar_prefetch=0,
            grid=grid,
            in_specs=in_specs,
            out_specs=tuple(out_specs),
        ),
        compiler_params=pltpu.CompilerParams(
            dimension_semantics=("parallel", "parallel", "parallel"),
            vmem_limit_bytes=32 * 1024 * 1024,   # safe on v5e/v6e/v7x
        ),
    )(*args)

    if return_attn:
        ctx, attn = outs
        return ctx, attn
    return outs[0], None


# ----------------------------- reference + test ------------------------------


def _reference(Q, K, V, d_k, attn_mask=None):
    scores = jnp.matmul(Q, jnp.swapaxes(K, -1, -2)) / jnp.sqrt(jnp.float32(d_k))
    scores = jnp.exp(scores)
    if attn_mask is not None:
        scores = scores * attn_mask
    attn = scores / (jnp.sum(scores, axis=-1, keepdims=True) + 1e-8)
    context = jnp.matmul(attn, V)
    return context, attn


if __name__ == "__main__":
    key = jax.random.PRNGKey(0)
    kq, kk, kv, km = jax.random.split(key, 4)

    B, H, S, d_k, d_v = 2, 2, 8, 32, 32
    Q = jax.random.normal(kq, (B, H, S, d_k), dtype=jnp.float32)
    K = jax.random.normal(kk, (B, H, S, d_k), dtype=jnp.float32)
    V = jax.random.normal(kv, (B, H, S, d_v), dtype=jnp.float32)
    full_mask = (jax.random.uniform(km, (B, H, S, S)) > 0.2).astype(jnp.float32)
    key_mask = (jax.random.uniform(km, (B, 1, 1, S)) > 0.2).astype(jnp.float32)

    # No mask
    ctx, attn = scaled_dot_product_attention(Q, K, V, attn_mask=None, d_k=d_k)
    jax.block_until_ready((ctx, attn))
    ctx_ref, attn_ref = _reference(Q, K, V, d_k)
    assert jnp.allclose(ctx, ctx_ref, atol=1e-4, rtol=1e-4)
    assert jnp.allclose(attn, attn_ref, atol=1e-4, rtol=1e-4)

    # Full (B, H, S, S) mask
    ctx_m, attn_m = scaled_dot_product_attention(Q, K, V, attn_mask=full_mask,
                                                 d_k=d_k)
    jax.block_until_ready((ctx_m, attn_m))
    ctx_mr, attn_mr = _reference(Q, K, V, d_k, attn_mask=full_mask)
    assert jnp.allclose(ctx_m, ctx_mr, atol=1e-4, rtol=1e-4)
    assert jnp.allclose(attn_m, attn_mr, atol=1e-4, rtol=1e-4)

    # Key-only (B, 1, 1, S) mask — exercises the no-HBM-broadcast path.
    ctx_k, attn_k = scaled_dot_product_attention(Q, K, V, attn_mask=key_mask,
                                                 d_k=d_k)
    jax.block_until_ready((ctx_k, attn_k))
    ctx_kr, attn_kr = _reference(Q, K, V, d_k, attn_mask=key_mask)
    assert jnp.allclose(ctx_k, ctx_kr, atol=1e-4, rtol=1e-4)
    assert jnp.allclose(attn_k, attn_kr, atol=1e-4, rtol=1e-4)

    # Context-only path (skips the O(S^2) attn writeback).
    ctx_only, none_attn = scaled_dot_product_attention(
        Q, K, V, attn_mask=full_mask, d_k=d_k, return_attn=False)
    jax.block_until_ready(ctx_only)
    assert none_attn is None
    assert jnp.allclose(ctx_only, ctx_mr, atol=1e-4, rtol=1e-4)

    print("KERNEL_OK")
</pallas_src>

<mosaic_0001>
module attributes {stable_mosaic.version = 11 : i64} {
  func.func @_sdpa_kernel(%arg0: i32, %arg1: i32, %arg2: i32, %arg3: memref<1x2x8x32xf32, #tpu.memory_space<vmem>>, %arg4: memref<1x2x8x32xf32, #tpu.memory_space<vmem>>, %arg5: memref<1x2x8x32xf32, #tpu.memory_space<vmem>>, %arg6: memref<1x2x8x32xf32, #tpu.memory_space<vmem>>, %arg7: memref<1x2x8x8xf32, #tpu.memory_space<vmem>>) attributes {dimension_semantics = [#tpu.dimension_semantics<parallel>, #tpu.dimension_semantics<parallel>, #tpu.dimension_semantics<parallel>], iteration_bounds = array<i64: 2, 1, 1>, scalar_prefetch = 0 : i64, scratch_operands = 0 : i64, tpu.core_type = #tpu.core_type<tc>, window_params = [{transform_indices = @transform_0, window_bounds = array<i64: 1, 2, 8, 32>}, {transform_indices = @transform_1, window_bounds = array<i64: 1, 2, 8, 32>}, {transform_indices = @transform_2, window_bounds = array<i64: 1, 2, 8, 32>}, {transform_indices = @transform_3, window_bounds = array<i64: 1, 2, 8, 32>}, {transform_indices = @transform_4, window_bounds = array<i64: 1, 2, 8, 8>}]} {
    %c0 = arith.constant 0 : index
    %c0_0 = arith.constant 0 : index
    %c0_1 = arith.constant 0 : index
    %c0_2 = arith.constant 0 : index
    %0 = vector.load %arg3[%c0, %c0_0, %c0_1, %c0_2] : memref<1x2x8x32xf32, #tpu.memory_space<vmem>>, vector<1x2x8x32xf32>
    %1 = vector.shape_cast %0 : vector<1x2x8x32xf32> to vector<2x8x32xf32>
    %cst = arith.constant 0.176776692 : f32
    %2 = vector.broadcast %cst : f32 to vector<2x8x32xf32>
    %3 = arith.mulf %1, %2 : vector<2x8x32xf32>
    %c0_3 = arith.constant 0 : index
    %c0_4 = arith.constant 0 : index
    %c0_5 = arith.constant 0 : index
    %c0_6 = arith.constant 0 : index
    %4 = vector.load %arg4[%c0_3, %c0_4, %c0_5, %c0_6] : memref<1x2x8x32xf32, #tpu.memory_space<vmem>>, vector<1x2x8x32xf32>
    %5 = vector.shape_cast %4 : vector<1x2x8x32xf32> to vector<2x8x32xf32>
    %c0_7 = arith.constant 0 : index
    %c0_8 = arith.constant 0 : index
    %c0_9 = arith.constant 0 : index
    %c0_10 = arith.constant 0 : index
    %6 = vector.load %arg5[%c0_7, %c0_8, %c0_9, %c0_10] : memref<1x2x8x32xf32, #tpu.memory_space<vmem>>, vector<1x2x8x32xf32>
    %7 = vector.shape_cast %6 : vector<1x2x8x32xf32> to vector<2x8x32xf32>
    "tpu.trace_start"() <{level = 10 : i32, message = "hqd,hkd->hqk"}> : () -> ()
    %cst_11 = arith.constant dense<0.000000e+00> : vector<2x8x8xf32>
    %8 = tpu.matmul %3, %5, %cst_11 {dimension_numbers = #tpu.dot_dimension_numbers<[2], [2], [1], [1], [0, 0, 0, 1, 1, 1], [0], [0]>} : vector<2x8x32xf32>, vector<2x8x32xf32>, vector<2x8x8xf32> -> vector<2x8x8xf32>
    "tpu.trace_stop"() : () -> ()
    %9 = math.exp %8 : vector<2x8x8xf32>
    %cst_12 = arith.constant dense<0.000000e+00> : vector<2x8xf32>
    %10 = vector.multi_reduction <add>, %9, %cst_12 [2] : vector<2x8x8xf32> to vector<2x8xf32>
    %11 = vector.shape_cast %10 : vector<2x8xf32> to vector<2x8x1xf32>
    %cst_13 = arith.constant 9.99999993E-9 : f32
    %12 = vector.broadcast %cst_13 : f32 to vector<2x8x1xf32>
    %13 = arith.addf %11, %12 : vector<2x8x1xf32>
    %14 = tpu.reciprocal %13 : vector<2x8x1xf32> -> vector<2x8x1xf32>
    %15 = vector.broadcast %14 : vector<2x8x1xf32> to vector<2x8x8xf32>
    %16 = arith.mulf %9, %15 : vector<2x8x8xf32>
    "tpu.trace_start"() <{level = 10 : i32, message = "hqk,hkd->hqd"}> : () -> ()
    %cst_14 = arith.constant dense<0.000000e+00> : vector<2x8x32xf32>
    %17 = tpu.matmul %16, %7, %cst_14 {dimension_numbers = #tpu.dot_dimension_numbers<[2], [1], [1], [2], [0, 0, 0, 1, 1, 2], [0], [0]>} : vector<2x8x8xf32>, vector<2x8x32xf32>, vector<2x8x32xf32> -> vector<2x8x32xf32>
    "tpu.trace_stop"() : () -> ()
    %c0_15 = arith.constant 0 : index
    %c0_16 = arith.constant 0 : index
    %c0_17 = arith.constant 0 : index
    %c0_18 = arith.constant 0 : index
    %18 = vector.load %arg6[%c0_15, %c0_16, %c0_17, %c0_18] : memref<1x2x8x32xf32, #tpu.memory_space<vmem>>, vector<1x2x8x32xf32>
    %19 = vector.shape_cast %18 : vector<1x2x8x32xf32> to vector<2x8x32xf32>
    %20 = vector.shape_cast %17 : vector<2x8x32xf32> to vector<1x2x8x32xf32>
    tpu.vector_store %arg6[%c0_15, %c0_16, %c0_17, %c0_18], %20 {strides = array<i32>} : memref<1x2x8x32xf32, #tpu.memory_space<vmem>>, vector<1x2x8x32xf32>,
    %c0_19 = arith.constant 0 : index
    %c0_20 = arith.constant 0 : index
    %c0_21 = arith.constant 0 : index
    %c0_22 = arith.constant 0 : index
    %21 = vector.load %arg7[%c0_19, %c0_20, %c0_21, %c0_22] : memref<1x2x8x8xf32, #tpu.memory_space<vmem>>, vector<1x2x8x8xf32>
    %22 = vector.shape_cast %21 : vector<1x2x8x8xf32> to vector<2x8x8xf32>
    %23 = vector.shape_cast %16 : vector<2x8x8xf32> to vector<1x2x8x8xf32>
    tpu.vector_store %arg7[%c0_19, %c0_20, %c0_21, %c0_22], %23 {strides = array<i32>} : memref<1x2x8x8xf32, #tpu.memory_space<vmem>>, vector<1x2x8x8xf32>,
    return
  }
  func.func @transform_0(%arg0: i32, %arg1: i32, %arg2: i32) -> (i32, i32, i32, i32) {
    %c0_i32 = arith.constant 0 : i32
    %c0_i32_0 = arith.constant 0 : i32
    return %arg0, %arg1, %arg2, %c0_i32 : i32, i32, i32, i32
  }
  func.func @transform_1(%arg0: i32, %arg1: i32, %arg2: i32) -> (i32, i32, i32, i32) {
    %c0_i32 = arith.constant 0 : i32
    %c0_i32_0 = arith.constant 0 : i32
    %c0_i32_1 = arith.constant 0 : i32
    return %arg0, %arg1, %c0_i32, %c0_i32_0 : i32, i32, i32, i32
  }
  func.func @transform_2(%arg0: i32, %arg1: i32, %arg2: i32) -> (i32, i32, i32, i32) {
    %c0_i32 = arith.constant 0 : i32
    %c0_i32_0 = arith.constant 0 : i32
    %c0_i32_1 = arith.constant 0 : i32
    return %arg0, %arg1, %c0_i32, %c0_i32_0 : i32, i32, i32, i32
  }
  func.func @transform_3(%arg0: i32, %arg1: i32, %arg2: i32) -> (i32, i32, i32, i32) {
    %c0_i32 = arith.constant 0 : i32
    %c0_i32_0 = arith.constant 0 : i32
    return %arg0, %arg1, %arg2, %c0_i32 : i32, i32, i32, i32
  }
  func.func @transform_4(%arg0: i32, %arg1: i32, %arg2: i32) -> (i32, i32, i32, i32) {
    %c0_i32 = arith.constant 0 : i32
    %c0_i32_0 = arith.constant 0 : i32
    return %arg0, %arg1, %arg2, %c0_i32 : i32, i32, i32, i32
  }
}

</mosaic_0001>

<bundles_post_ra>
// kernel: tpu_custom_call.1
= control target key start
LH: loop header
LB: loop body
LE: loop exit
PB: predicated region body
PF: predicated region fallthrough
CT: control target
= control target key end

     0   :  { %s1642_s0 = inlined_call_operand.hbm [shape: f32[2,2,8,32], index: 0, kind: input, shape index: {}]   ;;  %s1643_s1 = inlined_call_operand.hbm [shape: f32[2,2,8,32], index: 1, kind: input, shape index: {}]   ;;  %s1644_s2 = inlined_call_operand.hbm [shape: f32[2,2,8,32], index: 2, kind: input, shape index: {}]   ;;  %s1645_s3 = inlined_call_operand.hbm [shape: f32[2,2,8,32], index: 3, kind: output, shape index: {0}]   ;;  %s1646_s4 = inlined_call_operand.hbm [shape: f32[2,2,8,8], index: 4, kind: output, shape index: {1}]  }
   0x1   :  { %1658 = sst [smem:[#allocation19_spill]] %s1643_s1 }
   0x2   :  { %10 = vsyncpa [#allocation3], 0 }
   0x3   :  { %12 = vsyncpa [#allocation3 + $0x1], 0 }
   0x4   :  { %13 = vsyncpa [#allocation6], 0 }
   0x5   :  { %15 = vsyncpa [#allocation6 + $0x1], 0 }
   0x6   :  { %16 = vsyncpa [#allocation4], 0 }
   0x7   :  { %18 = vsyncpa [#allocation4 + $0x1], 0 }
   0x8   :  { %19 = vsyncpa [#allocation10], 0 }
   0x9   :  { %21 = vsyncpa [#allocation10 + $0x1], 0  ;;  %s1300_s15 = smov 0   ;;  %s1302_s16 = smov 0  }
   0xa   :  { %s1304_s17 = smov 0   ;;  %s1306_s18 = smov 0  }
   0xb   :  { %s1308_s19 = smov 0   ;;  %s1310_s20 = smov 0  }
   0xc LB: > { %1659 = sst [smem:[#allocation15_spill]] %s1258_s19  ;;  %s1331_s21 = sadd.s32 4294967295, %s1262_s20   ;;  %s1262_s20 = sphi %s1310_s20, %s27_s20   ;;  %s1258_s19 = sphi %s1308_s19, %s1684_s19   ;;  %s1254_s18 = sphi %s1306_s18, %s1683_s18   ;;  %s1250_s17 = sphi %s1304_s17, %s1687_s17   ;;  %s1246_s16 = sphi %s1302_s16, %s1686_s16   ;;  %s1242_s15 = sphi %s1300_s15, %s1685_s15  }
   0xd   : > { %1660 = sst [smem:[#allocation16_spill]] %s1262_s20  ;;  %s898_s22 = sadd.s32 4294967294, %s1262_s20  }
   0xe   : > { %s46_s23 = sadd.s32 1, %s1258_s19  ;;  %s57_s24 = sadd.s32 1, %s1250_s17 }
   0xf   : > { %p48_p0 = scmp.ge.s32.totalorder %s46_s23, 2  ;;  %p64_p1 = scmp.ne.s32.totalorder %s1250_s17, %s1246_s16 }
  0x10   : > { %p65_p2 = scmp.eq.s32.totalorder %s1262_s20, 0  ;;  %p70_p3 = scmp.ne.s32.totalorder %s1246_s16, %s1242_s15 }
  0x11   : > { %s1689_s23 = smov (%p48_p0, %s46_s23), 0  ;;  %p71_p5 = scmp.eq.s32.totalorder %s1331_s21, 0 }
  0x12   : > { %1661 = sst [smem:[#allocation17_spill]] %s1689_s23  ;;  %p1343_p4 = por %p65_p2, %p64_p1 }
  0x13   : > { %s50_s26 = ssub.s32 %s1258_s19, %s1689_s23  ;;  %p154_p6 = scmp.eq.s32.totalorder %s1331_s21, 1 }
  0x14   : > { %p55_p7 = scmp.eq.s32.totalorder %s50_s26, 0  ;;  %p1351_p8 = por %p71_p5, %p70_p3 }
  0x15   : > { %p1355_p9 = por %p154_p6, %p64_p1  ;;  %p160_p10 = scmp.eq.s32.totalorder %s898_s22, 1 }
  0x16   : > { %s1663_s27 = scalar_select %p1351_p8, 1, 0 }
  0x17   : > { %s1664_s28 = scalar_select %p1355_p9, 1, 0 }
  0x18   : > { %s1360_s29 = scalar_select %p55_p7, %s1250_s17, %s57_s24  }
  0x19   : > { %p1362_p11 = por %p160_p10, %p70_p3  ;;  %p990_p13 = scmp.lt.s32.totalorder %s1262_s20, 2 }
  0x1a   : > { %1665 = sst [smem:[#allocation18_spill]] %s1360_s29  ;;  %s1647_s5 = sand.u32 1, %s1250_s17  }
  0x1b   : > { %s1666_s30 = scalar_select %p1362_p11, 1, 0 }
  0x1c   : > { %s1371_s6 = sshll.u32 %s1647_s5, 4  ;;  %s1374_s7 = sshll.u32 %s1258_s19, 8 }
  0x1d   : > { %p1378_p0 = pnand %p990_p13, %p1343_p4  ;;  %s234_s9 = sand.u32 1, %s1262_s20  }
  0x1e   : > { %s1668_s1 = sld [smem:[#allocation19_spill]]  ;;  %s238_s13 = scalar_lea.vmem [#allocation5], %s1371_s6 }
  0x1f   : > { %s247_s14 = sshll.u32 %s238_s13, 4  ;;  %s1394_s22 = scalar_lea.sflag [#allocation6], %s234_s9  ;;  %s1391_s14 = int_to_ptr.vmem [resolvable:$true] %s247_s14 }
  0x20   : > { %p1400_p4 = pneg %p1378_p0 }
  0x24   : > { %s1387_s12 = scalar_lea.hbm %s1668_s1, %s1374_s7  ;;  %s1059_s11 = scalar_lea.hbm %s1668_s1, 512 }
  0x25   : > { %s1054_s24 = scalar_lea.hbm %s1387_s12, 256  ;;  %p1060_p7 = scmp.lt.u32.totalorder %s1387_s12, %s1668_s1 }
  0x26   : > { %p1055_p3 = scmp.ne.s32.totalorder %s1387_s12, %s1054_s24  ;;  %p1061_p10 = scmp.lt.u32.totalorder %s1059_s11, %s1054_s24 }
  0x27   : > { %p1063_p12 = scmp.lt.u32.totalorder %s1054_s24, %s1387_s12 }
  0x28   : > { %p1057_p5 = pnand %p1400_p4, %p1055_p3  ;;  %p1062_p13 = por %p1061_p10, %p1060_p7 }
  0x2a   : > { %p1058_p6 = pneg %p1057_p5  ;;  %p1064_p1 = por %p1063_p12, %p1062_p13 }
  0x2c   : > { %p1065_p2 = pnand %p1064_p1, %p1058_p6 }
  0x2e   : > { %1068 = shalt.err (!%p1065_p2)
}
  0x2f   : > { %s1069_s9 = scalar_lea.vmem %s1391_s14, 256  ;;  %s1264_s26 = smov [#allocation5]  }
  0x30   : > { %p1070_p3 = scmp.ne.s32.totalorder %s1391_s14, %s1069_s9  ;;  %s1074_s10 = sshll.u32 %s1264_s26, 4  ;;  %s1075_s10 = int_to_ptr.vmem [resolvable:$false] %s1074_s10 }
  0x31   : > { %s1076_s5 = scalar_lea.vmem %s1075_s10, 512  ;;  %p1077_p9 = scmp.lt.s32.totalorder %s1391_s14, %s1075_s10 }
  0x32   : > { %p1072_p5 = pnand %p1070_p3, %p1400_p4  ;;  %p1078_p8 = scmp.lt.s32.totalorder %s1076_s5, %s1069_s9 }
  0x34   : > { %p1073_p11 = pneg %p1072_p5  ;;  %p1079_p7 = por %p1078_p8, %p1077_p9 }
  0x36   : > { %p1080_p10 = pnand %p1079_p7, %p1073_p11 }
  0x38   : > { %1083 = shalt.err (!%p1080_p10)
}
  0x39   : > { %s1650_s24 = smov 128   ;;  %s1652_s11 = smov 8  }
  0x3a   : > { %979 = dma.hbm_to_vmem [thread:$0]  (!%p1378_p0), %s1387_s12, 256, %s1391_s14, %s1394_s22, %s1650_s24, %s1650_s24, %s1652_s11  }
  0x3b   : > { %p1670_p8 = scmp.lt.s32.totalorder %s1262_s20, 3  ;;  %p1671_p9 = scmp.ge.s32.totalorder %s1262_s20, 1 }
  0x3c   : > { %s1439_s10 = scalar_lea.hbm %s1642_s0, %s1374_s7  ;;  %s214_s5 = scalar_lea.vmem [#allocation2], %s1371_s6 }
  0x3d   : > { %p1431_p11 = pnand %p1671_p9, %p1670_p8  ;;  %s224_s1 = sshll.u32 %s214_s5, 4  ;;  %s1442_s1 = int_to_ptr.vmem [resolvable:$true] %s224_s1 }
  0x3e   : > { %s1448_s24 = scalar_lea.hbm %s1644_s2, %s1374_s7  ;;  %s1673_s11 = sand.u32 1, %s1250_s17  }
  0x3f   : > { %s1672_s13 = scalar_select %p1431_p11, 1, 0 }
  0x40   : > { %s1452_s23 = scalar_lea.sflag [#allocation3], %s1673_s11  ;;  %s1084_s19 = scalar_lea.hbm %s1439_s10, 256 }
  0x41   : > { %p1085_p12 = scmp.ne.s32.totalorder %s1439_s10, %s1084_s19  ;;  %s1089_s29 = scalar_lea.hbm %s1642_s0, 512 }
  0x42   : > { %p1090_p6 = scmp.lt.u32.totalorder %s1439_s10, %s1642_s0  ;;  %p1091_p13 = scmp.lt.u32.totalorder %s1089_s29, %s1084_s19 }
  0x43   : > { %p1087_p1 = pnand %p1085_p12, %p1400_p4  ;;  %p1093_p5 = scmp.lt.u32.totalorder %s1084_s19, %s1439_s10 }
  0x44   : > { %p1092_p3 = por %p1091_p13, %p1090_p6 }
  0x45   : > { %p1088_p2 = pneg %p1087_p1 }
  0x46   : > { %p1094_p7 = por %p1093_p5, %p1092_p3 }
  0x48   : > { %p1095_p10 = pnand %p1094_p7, %p1088_p2 }
  0x4a   : > { %1098 = shalt.err (!%p1095_p10)
}
  0x4b   : > { %s1099_s7 = scalar_lea.vmem %s1442_s1, 256  ;;  %s1267_s11 = smov [#allocation2]  }
  0x4c   : > { %p1100_p8 = scmp.ne.s32.totalorder %s1442_s1, %s1099_s7  ;;  %s1104_s12 = sshll.u32 %s1267_s11, 4  ;;  %s1105_s12 = int_to_ptr.vmem [resolvable:$false] %s1104_s12 }
  0x4d   : > { %s1106_s20 = scalar_lea.vmem %s1105_s12, 512  ;;  %p1107_p1 = scmp.lt.s32.totalorder %s1442_s1, %s1105_s12 }
  0x4e   : > { %p1102_p9 = pnand %p1100_p8, %p1400_p4  ;;  %p1108_p11 = scmp.lt.s32.totalorder %s1106_s20, %s1099_s7 }
  0x50   : > { %p1103_p12 = pneg %p1102_p9  ;;  %p1109_p6 = por %p1108_p11, %p1107_p1 }
  0x52   : > { %p1110_p13 = pnand %p1109_p6, %p1103_p12 }
  0x54   : > { %1113 = shalt.err (!%p1110_p13)
}
  0x55   : > { %s1674_s19 = smov 8   ;;  %s1675_s29 = smov 128  }
  0x56   : > { %976 = dma.hbm_to_vmem [thread:$0]  (!%p1378_p0), %s1439_s10, 256, %s1442_s1, %s1452_s23, %s1675_s29, %s1675_s29, %s1674_s19  }
  0x57   : > { %s261_s14 = scalar_lea.vmem [#allocation7], %s1371_s6  ;;  %s1114_s26 = scalar_lea.hbm %s1448_s24, 256 }
  0x58   : > { %s270_s9 = sshll.u32 %s261_s14, 4  ;;  %p1115_p11 = scmp.ne.s32.totalorder %s1448_s24, %s1114_s26  ;;  %s1480_s9 = int_to_ptr.vmem [resolvable:$true] %s270_s9 }
  0x59   : > { %s1119_s11 = scalar_lea.hbm %s1644_s2, 512  ;;  %p1120_p5 = scmp.lt.u32.totalorder %s1448_s24, %s1644_s2 }
  0x5a   : > { %p1117_p2 = pnand %p1115_p11, %p1400_p4  ;;  %p1121_p7 = scmp.lt.u32.totalorder %s1119_s11, %s1114_s26 }
  0x5b   : > { %p1123_p8 = scmp.lt.u32.totalorder %s1114_s26, %s1448_s24 }
  0x5c   : > { %p1118_p3 = pneg %p1117_p2  ;;  %p1122_p10 = por %p1121_p7, %p1120_p5 }
  0x5e   : > { %p1124_p9 = por %p1123_p8, %p1122_p10 }
  0x60   : > { %p1125_p12 = pnand %p1124_p9, %p1118_p3 }
  0x62   : > { %1128 = shalt.err (!%p1125_p12)
}
  0x63   : > { %s1129_s1 = scalar_lea.vmem %s1480_s9, 256  ;;  %s1268_s23 = smov [#allocation7]  }
  0x64   : > { %p1130_p1 = scmp.ne.s32.totalorder %s1480_s9, %s1129_s1  ;;  %s1134_s6 = sshll.u32 %s1268_s23, 4  ;;  %s1135_s6 = int_to_ptr.vmem [resolvable:$false] %s1134_s6 }
  0x65   : > { %s1136_s10 = scalar_lea.vmem %s1135_s6, 512  ;;  %p1137_p11 = scmp.lt.s32.totalorder %s1480_s9, %s1135_s6 }
  0x66   : > { %p1132_p6 = pnand %p1130_p1, %p1400_p4  ;;  %p1138_p2 = scmp.lt.s32.totalorder %s1136_s10, %s1129_s1 }
  0x68   : > { %p1133_p13 = pneg %p1132_p6  ;;  %p1139_p5 = por %p1138_p2, %p1137_p11 }
  0x6a   : > { %p1140_p7 = pnand %p1139_p5, %p1133_p13 }
  0x6c   : > { %1143 = shalt.err (!%p1140_p7)
}
  0x6d   : > { %982 = dma.hbm_to_vmem [thread:$0]  (!%p1378_p0), %s1448_s24, 256, %s1480_s9, %s1394_s22, %s1675_s29, %s1675_s29, %s1674_s19  }
  0x6e   : > { %p1676_p4 = scmp.ne.s32.totalorder %s1672_s13, 0 }
  0x6f   : > { %s1510_s25 = sand.u32 (!%p1676_p4), 1, %s1246_s16   ;;  %p1677_p3 = scmp.ne.s32.totalorder (!%p1676_p4), %s1663_s27, 0 }
  0x70   : > { %282 = sbr.rel (%p1676_p4) target bundleno = 742 (0x2e6), region = 32  ;;  %s1513_s14 = sshll.u32 (!%p1676_p4), %s1510_s25, 4 }
  0x71   : > { %s285_s8 = scalar_lea.sflag (!%p1676_p4), [#allocation3], %s1510_s25  ;;  %s288_s26 = scalar_lea.vmem (!%p1676_p4), [#allocation2], %s1513_s14 }
  0x77   : > { %1225 = dma.done.wait (%p1677_p3), %s285_s8, 256  }
  0x78   : > { %1227 = vsyncadd (%p1677_p3), %s285_s8, 4294967040  ;;  %s293_s22 = sand.u32 1, %s1331_s21   ;;  %s297_s13 = scalar_lea.vmem [#allocation5], %s1513_s14 }
  0x79   : > { %s294_s24 = scalar_lea.sflag [#allocation6], %s293_s22 }
  0x7a   : > { %1229 = dma.done.wait (%p1677_p3), %s294_s24, 512  }
  0x7b   : > { %1231 = vsyncadd (%p1677_p3), %s294_s24, 4294966784  ;;  %v1269_v0 = vmov 0.0   ;;  %vm1270_vm0 = vmmov 0   ;;  %vm359_vm1 = vcmask 261120   ;;  %v355_v1 = vld [vmem:[%s297_s13] sm:$0xff]  ;;  %v356_v3 = vld [vmem:[%s297_s13 + $0x8] sm:$0xff] }
  0x7c   : > { %943 = vmatprep.subr.mxu0 %v1269_v0  ;;  %945 = vmatprep.mubr.msk.f32.mxu0 %vm1270_vm0, %v1269_v0  ;;  %v351_v2 = vld [vmem:[%s288_s26] sm:$0xff]  ;;  %v352_v5 = vld [vmem:[%s288_s26 + $0x8] sm:$0xff]  ;;  %vm516_vm2 = vcmask 64512   ;;  %s306_s21 = scalar_lea.vmem [#allocation7], %s1513_s14  ;;  %s345_s27 = scalar_lea.vmem [#allocation9], %s1513_s14 }
  0x7d   : > { %948 = vmatprep.subr.mxu1 %v1269_v0  ;;  %950 = vmatprep.mubr.msk.f32.mxu1 %vm1270_vm0, %v1269_v0  ;;  %v353_v4 = vmul.f32 0.17677669, %v351_v2  ;;  %v354_v6 = vmul.f32 0.17677669, %v352_v5  ;;  %v357_v17 = vld [vmem:[%s306_s21] sm:$0xff]  ;;  %v358_v18 = vld [vmem:[%s306_s21 + $0x8] sm:$0xff] }
  0x7e   : > { %944 = vmatpush3.xpose.msk.msra.mxu0 %vm359_vm1, %v355_v1  ;;  %949 = vmatpush3.xpose.msk.msra.mxu1 %vm359_vm1, %v356_v3  ;;  %s933_s19 = sshll.u32 %s1254_s18, 8  ;;  %s720_s29 = sshll.u32 %s345_s27, 4  ;;  %s1551_s29 = int_to_ptr.vmem [resolvable:$true] %s720_s29 }
  0x7f   : > { %953 = vmatprep.subr.mxu0 %v1269_v0  ;;  %958 = vmatprep.subr.mxu1 %v1269_v0  ;;  %s1549_s7 = scalar_lea.hbm %s1646_s4, %s933_s19  ;;  %s685_s11 = scalar_lea.sflag [#allocation10], %s1510_s25 }
  0x80   : > { %s1144_s12 = scalar_lea.vmem %s1551_s29, 256  ;;  %p1678_p10 = scmp.ne.s32.totalorder %s1664_s28, 0 }
  0x81   : > { %946 = vmatmul.mubr.msk.f32.vlgmr.msra.gmra.mrb[0].mxu0 %vm359_vm1, %v353_v4  ;;  %951 = vmatmul.mubr.msk.f32.vlgmr.msra.gmra.mrb[0].mxu1 %vm359_vm1, %v354_v6  ;;  %p1145_p0 = scmp.ne.s32.totalorder %s1551_s29, %s1144_s12  ;;  %s1271_s20 = smov [#allocation9]  }
  0x82   : > { %955 = vmatprep.mubr.msk.f32.mxu0 %vm1270_vm0, %v1269_v0  ;;  %960 = vmatprep.mubr.msk.f32.mxu1 %vm1270_vm0, %v1269_v0  ;;  %s1148_s1 = sshll.u32 %s1271_s20, 4  ;;  %s1149_s1 = int_to_ptr.vmem [resolvable:$false] %s1148_s1 }
  0x83   : > { %954 = vmatpush3.msra.mxu0 %v357_v17  ;;  %959 = vmatpush3.msra.mxu1 %v358_v18  ;;  %p1146_p8 = pnand %p1145_p0, %p1678_p10  ;;  %s1150_s23 = scalar_lea.vmem %s1149_s1, 512 }
  0x84   : > { %p1151_p12 = scmp.lt.s32.totalorder %s1551_s29, %s1149_s1  ;;  %p1152_p1 = scmp.lt.s32.totalorder %s1150_s23, %s1144_s12 }
  0x85   : > { %p1147_p9 = pneg %p1146_p8 }
  0x86   : > { %p1153_p6 = por %p1152_p1, %p1151_p12 }
  0x88   : > { %p1154_p13 = pnand %p1153_p6, %p1147_p9 }
 0x154   : > { %v432_v7 = vpop.f32.mrb[0].mxu0  ;;  %v508_v8 = vpop.f32.mrb[0].mxu1 }
 0x155   : > { %v512_v9 = vmul.f32 1.442695, %v432_v7  ;;  %v947_v10 = vpop.f32.mrb[1].mxu0  ;;  %v514_v11 = vmul.f32 1.442695, %v508_v8  ;;  %v952_v12 = vpop.f32.mrb[1].mxu1 }
 0x157   : > { %1046 = vpow2.f32 %v512_v9 }
 0x158   : > { %1048 = vpow2.f32 %v514_v11 }
 0x161   : > { %v1047_v13 = vpop.eup %1046 }
 0x162   : > { %v1049_v14 = vpop.eup %1048  ;;  %v517_v15 = vsel %vm516_vm2, %v1047_v13, 0.0 }
 0x163   : > { %518 = vadd.xlane.f32.xlu0 %v517_v15  ;;  %v520_v16 = vsel %vm516_vm2, %v1049_v14, 0.0 }
 0x167   : > { %521 = vadd.xlane.f32.xlu0 %v520_v16 }
 0x1f0   : > { %v519_v19 = vpop.xlane.xlu0 %518 }
 0x1f1   : > { %v523_v20 = vadd.f32 1e-08, %v519_v19 }
 0x1f3   : > { %1050 = vrcp.f32 %v523_v20 }
 0x1f4   : > { %v522_v21 = vpop.xlane.xlu0 %521 }
 0x1f5   : > { %v524_v22 = vadd.f32 1e-08, %v522_v21 }
 0x1f7   : > { %1052 = vrcp.f32 %v524_v22 }
 0x1fd   : > { %v1051_v23 = vpop.eup %1050 }
 0x1fe   : > { %v527_v24 = vmul.f32 %v1051_v23, %v1047_v13 }
 0x200   : > { %956 = vmatmul.mubr.msk.f32.vlgmr.msra.gmra.mrb[2].mxu0 %vm516_vm2, %v527_v24  ;;  %677 = vst.msk [vmem:[%s345_s27] sm:$0xff] %vm516_vm2, %v527_v24 }
 0x201   : > { %v1053_v25 = vpop.eup %1052 }
 0x202   : > { %v528_v26 = vmul.f32 %v1053_v25, %v1049_v14 }
 0x204   : > { %961 = vmatmul.mubr.msk.f32.vlgmr.msra.gmra.mrb[2].mxu1 %vm516_vm2, %v528_v26  ;;  %678 = vst.msk [vmem:[%s345_s27 + $0x8] sm:$0xff] %vm516_vm2, %v528_v26 }
 0x205   : > { %1157 = shalt.err (!%p1154_p13)
}
 0x206   : > { %s1158_s6 = scalar_lea.hbm %s1549_s7, 256  ;;  %s1162_s26 = scalar_lea.hbm %s1646_s4, 512 }
 0x207   : > { %p1159_p11 = scmp.ne.s32.totalorder %s1549_s7, %s1158_s6  ;;  %p1163_p7 = scmp.lt.u32.totalorder %s1549_s7, %s1646_s4 }
 0x208   : > { %p1164_p4 = scmp.lt.u32.totalorder %s1162_s26, %s1158_s6  ;;  %p1166_p0 = scmp.lt.u32.totalorder %s1158_s6, %s1549_s7 }
 0x209   : > { %p1160_p2 = pnand %p1159_p11, %p1678_p10 }
 0x20a   : > { %p1165_p3 = por %p1164_p4, %p1163_p7 }
 0x20b   : > { %p1161_p5 = pneg %p1160_p2 }
 0x20c   : > { %p1167_p8 = por %p1166_p0, %p1165_p3 }
 0x20e   : > { %p1168_p9 = pnand %p1167_p8, %p1161_p5 }
 0x210   : > { %1171 = shalt.err (!%p1168_p9)
}
 0x211   : > { %s1272_s13 = smov 128   ;;  %s1273_s21 = smov 8  }
 0x212   : > { %970 = dma.vmem_to_hbm [thread:$0]  (%p1678_p10), %s1551_s29, 256, %s1549_s7, %s685_s11, %s1272_s13, %s1272_s13, %s1273_s21  }
 0x213   : > { %s338_s27 = scalar_lea.vmem [#allocation8], %s1513_s14  ;;  %s1589_s20 = scalar_lea.hbm %s1645_s3, %s933_s19 }
 0x214   : > { %s701_s9 = sshll.u32 %s338_s27, 4  ;;  %s680_s14 = scalar_lea.sflag [#allocation4], %s1510_s25  ;;  %s1582_s9 = int_to_ptr.vmem [resolvable:$true] %s701_s9 }
 0x215   : > { %s1172_s29 = scalar_lea.vmem %s1582_s9, 256  ;;  %s1274_s7 = smov [#allocation8]  }
 0x216   : > { %p1173_p12 = scmp.ne.s32.totalorder %s1582_s9, %s1172_s29  ;;  %s1176_s18 = sshll.u32 %s1274_s7, 4  ;;  %s1177_s18 = int_to_ptr.vmem [resolvable:$false] %s1176_s18 }
 0x217   : > { %s1178_s11 = scalar_lea.vmem %s1177_s18, 512  ;;  %p1179_p13 = scmp.lt.s32.totalorder %s1582_s9, %s1177_s18 }
 0x218   : > { %p1174_p1 = pnand %p1173_p12, %p1678_p10  ;;  %p1180_p11 = scmp.lt.s32.totalorder %s1178_s11, %s1172_s29 }
 0x21a   : > { %p1175_p6 = pneg %p1174_p1  ;;  %p1181_p2 = por %p1180_p11, %p1179_p13 }
 0x21c   : > { %p1182_p5 = pnand %p1181_p2, %p1175_p6 }
 0x2d3   : > { %v598_v27 = vpop.f32.mrb[2].mxu0 }
 0x2d4   : > { %675 = vst.msk [vmem:[%s338_s27] sm:$0xff] %vm359_vm1, %v598_v27  ;;  %v957_v28 = vpop.f32.mrb[3].mxu0 }
 0x2d7   : > { %v671_v29 = vpop.f32.mrb[2].mxu1 }
 0x2d8   : > { %676 = vst.msk [vmem:[%s338_s27 + $0x8] sm:$0xff] %vm359_vm1, %v671_v29  ;;  %v962_v30 = vpop.f32.mrb[3].mxu1 }
 0x2d9   : > { %1185 = shalt.err (!%p1182_p5)
}
 0x2da   : > { %s1186_s19 = scalar_lea.hbm %s1589_s20, 256  ;;  %s1190_s6 = scalar_lea.hbm %s1645_s3, 512 }
 0x2db   : > { %p1187_p7 = scmp.ne.s32.totalorder %s1589_s20, %s1186_s19  ;;  %p1191_p0 = scmp.lt.u32.totalorder %s1589_s20, %s1645_s3 }
 0x2dc   : > { %p1192_p8 = scmp.lt.u32.totalorder %s1190_s6, %s1186_s19  ;;  %p1194_p12 = scmp.lt.u32.totalorder %s1186_s19, %s1589_s20 }
 0x2dd   : > { %p1188_p4 = pnand %p1187_p7, %p1678_p10 }
 0x2de   : > { %p1193_p9 = por %p1192_p8, %p1191_p0 }
 0x2df   : > { %p1189_p3 = pneg %p1188_p4 }
 0x2e0   : > { %p1195_p1 = por %p1194_p12, %p1193_p9 }
 0x2e2   : > { %p1196_p6 = pnand %p1195_p1, %p1189_p3 }
 0x2e4   : > { %1199 = shalt.err (!%p1196_p6)
}
 0x2e5   : > { %969 = dma.vmem_to_hbm [thread:$0]  (%p1678_p10), %s1582_s9, 256, %s1589_s20, %s680_s14, %s1272_s13, %s1272_s13, %s1273_s21  }
 0x2e6 PF: > { %s1679_s26 = sld [smem:[#allocation16_spill]]  ;;  %s735_s22 = sand.u32 1, %s1242_s15  }
 0x2e7   : > { %p1680_p13 = scmp.ne.s32.totalorder %s1666_s30, 0  ;;  %s736_s24 = scalar_lea.sflag [#allocation4], %s735_s22 }
 0x2ec   : > { %p1681_p11 = scmp.ge.s32.totalorder %s1679_s26, 2 }
 0x2ee   : > { %p984_p2 = pnand %p1681_p11, %p1680_p13 }
 0x2f0   : > { %1233 = dma.done.wait (!%p984_p2), %s736_s24, 256  }
 0x2f1   : > { %1235 = vsyncadd (!%p984_p2), %s736_s24, 4294967040  ;;  %s745_s28 = scalar_lea.sflag [#allocation10], %s735_s22 }
 0x2f2   : > { %1237 = dma.done.wait (!%p984_p2), %s745_s28, 256  }
 0x2f3   : > { %1239 = vsyncadd (!%p984_p2), %s745_s28, 4294967040  ;;  %s27_s20 = sadd.s32 1, %s1679_s26   ;;  %s1682_s25 = sld [smem:[#allocation18_spill]] }
 0x2f4   : > { %p24_p5 = scmp.ge.s32.totalorder %s27_s20, 4   ;;  %s1683_s18 = sld [smem:[#allocation15_spill]] }
 0x2f5   : > { %s1684_s19 = sld [smem:[#allocation17_spill]]  ;;  %s1685_s15 = smov %s1246_s16 }
 0x2f6   : > { %s1686_s16 = smov %s1250_s17  ;;  %26 = sbr.rel (!%p24_p5) target bundleno = 12 (0xc), region = 118 }
 0x2f9   : > { %s1687_s17 = smov %s1682_s25 }
 0x2fd   :  { %750 = vsyncpa [#allocation3], 1 }
 0x2fe   :  { %752 = vsyncpa [#allocation3 + $0x1], 1 }
 0x2ff   :  { %753 = vsyncpa [#allocation6], 1 }
 0x300   :  { %755 = vsyncpa [#allocation6 + $0x1], 1 }
 0x301   :  { %756 = vsyncpa [#allocation4], 1 }
 0x302   :  { %758 = vsyncpa [#allocation4 + $0x1], 1 }
 0x303   :  { %759 = vsyncpa [#allocation10], 1 }
 0x304   :  { %761 = vsyncpa [#allocation10 + $0x1], 1 }

</bundles_post_ra>
